<compile_context>
chip_gen: v5e
topology: v5e:2x2
jax: 0.10.0
libtpu: 0.0.40
codegen_flags: <defaults>
</compile_context>

<pallas_src>
import jax
import jax.numpy as jnp
from jax.experimental import pallas as pl
from jax.experimental.pallas import tpu as pltpu


def _round_up(x, m):
    return (x + m - 1) // m * m


def _soft_q_kernel(s_ref, a_ref, w1s_ref, w1a_ref, b1_ref, w2_ref, b2_ref,
                   w3_ref, b3_ref, out_ref):
    # h1 = relu(state @ W1_s + action @ W1_a + b1)    (fused concat)
    h1 = jnp.dot(s_ref[...], w1s_ref[...], preferred_element_type=jnp.float32)
    h1 = h1 + jnp.dot(a_ref[...], w1a_ref[...],
                      preferred_element_type=jnp.float32)
    h1 = jnp.maximum(h1 + b1_ref[...], 0.0)

    # h2 = relu(h1 @ W2 + b2)
    h2 = jnp.dot(h1, w2_ref[...], preferred_element_type=jnp.float32)
    h2 = jnp.maximum(h2 + b2_ref[...], 0.0)

    # fc3: output width 1 -> VPU multiply + lane reduce (no wasted MXU pass),
    # written lane-dense as a [1, TILE_B] row.  b3 comes from SMEM as a scalar.
    q = jnp.sum(h2 * w3_ref[...], axis=-1) + b3_ref[0, 0]      # (TILE_B,)
    out_ref[...] = q.reshape(out_ref.shape).astype(out_ref.dtype)


def soft_q_forward(state, action, params, *, tile_b=512):
    """state: [B, S], action: [B, A]; returns Q-values [B, 1] (float32)."""
    w1s, w1a, b1, w2, b2, w3_row, b3 = params
    state = state.astype(jnp.float32)
    action = action.astype(jnp.float32)

    B, S = state.shape
    A = action.shape[1]
    H = w1s.shape[1]

    # Lane-aligned batch tile; shrink for tiny batches so the demo stays small.
    tb = min(tile_b, _round_up(max(B, 1), 128))
    Bp = _round_up(B, tb)
    num_tiles = Bp // tb
    if Bp != B:
        state = jnp.pad(state, ((0, Bp - B), (0, 0)))
        action = jnp.pad(action, ((0, Bp - B), (0, 0)))

    resident = lambda shape: pl.BlockSpec(shape, lambda i: (0,) * len(shape))

    out2d = pl.pallas_call(
        _soft_q_kernel,
        out_shape=jax.ShapeDtypeStruct((num_tiles, tb), jnp.float32),
        grid_spec=pltpu.PrefetchScalarGridSpec(
            num_scalar_prefetch=0,
            grid=(num_tiles,),
            in_specs=[
                pl.BlockSpec((tb, S), lambda i: (i, 0)),     # state tile
                pl.BlockSpec((tb, A), lambda i: (i, 0)),     # action tile
                resident((S, H)),                            # W1_s (VMEM-resident)
                resident((A, H)),                            # W1_a
                resident((1, H)),                            # b1
                resident((H, H)),                            # W2
                resident((1, H)),                            # b2
                resident((1, H)),                            # w3 row
                pl.BlockSpec(memory_space=pltpu.MemorySpace.SMEM),  # b3 scalar
            ],
            out_specs=pl.BlockSpec((1, tb), lambda i: (i, 0)),
        ),
        compiler_params=pltpu.CompilerParams(
            dimension_semantics=("parallel",)),
    )(state, action, w1s, w1a, b1, w2, b2, w3_row, b3)

    return out2d.reshape(Bp, 1)[:B]


def init_params(key, state_dim, action_dim, hidden_dim):
    """Deterministic synthetic params; weights stored as [in, out]."""
    din = state_dim + action_dim
    ks = jax.random.split(key, 6)

    def uniform_linear(kw, kb, fan_in, fan_out):
        # mimic PyTorch Linear default init U(-1/sqrt(fan_in), +1/sqrt(fan_in))
        bound = 1.0 / jnp.sqrt(float(fan_in))
        w = jax.random.uniform(kw, (fan_in, fan_out), jnp.float32, -bound, bound)
        b = jax.random.uniform(kb, (1, fan_out), jnp.float32, -bound, bound)
        return w, b

    w1, b1 = uniform_linear(ks[0], ks[1], din, hidden_dim)
    w2, b2 = uniform_linear(ks[2], ks[3], hidden_dim, hidden_dim)
    w3, b3 = uniform_linear(ks[4], ks[5], hidden_dim, 1)

    w1s, w1a = w1[:state_dim], w1[state_dim:]   # split for fused concat
    w3_row = w3.T                               # (1, H) row for VPU fc3
    return (w1s, w1a, b1, w2, b2, w3_row, b3)


if __name__ == "__main__":
    key = jax.random.PRNGKey(0)
    k_params, k_state, k_action = jax.random.split(key, 3)

    # Small shapes (panda-gym-ish dims, lane-aligned hidden width).
    batch, state_dim, action_dim, hidden_dim = 50, 12, 4, 128

    params = init_params(k_params, state_dim, action_dim, hidden_dim)
    state = jax.random.normal(k_state, (batch, state_dim), jnp.float32)
    action = jax.random.normal(k_action, (batch, action_dim), jnp.float32)

    q = jax.jit(soft_q_forward)(state, action, params)
    q = jax.block_until_ready(q)

    # Plain-JAX reference (original concat + three Linear layers).
    w1s, w1a, b1, w2, b2, w3_row, b3 = params
    x = jnp.concatenate([state, action], axis=1)
    w1 = jnp.concatenate([w1s, w1a], axis=0)
    ref = jnp.maximum(x @ w1 + b1, 0.0)
    ref = jnp.maximum(ref @ w2 + b2, 0.0)
    ref = ref @ w3_row.T + b3

    assert q.shape == (batch, 1)
    assert jnp.allclose(q, ref, atol=1e-4, rtol=1e-4), "mismatch vs reference"

    print("KERNEL_OK")
</pallas_src>

<mosaic_0001>
module attributes {stable_mosaic.version = 11 : i64} {
  func.func @_soft_q_kernel(%arg0: i32, %arg1: memref<128x12xf32, #tpu.memory_space<vmem>>, %arg2: memref<128x4xf32, #tpu.memory_space<vmem>>, %arg3: memref<12x128xf32, #tpu.memory_space<vmem>>, %arg4: memref<4x128xf32, #tpu.memory_space<vmem>>, %arg5: memref<1x128xf32, #tpu.memory_space<vmem>>, %arg6: memref<128x128xf32, #tpu.memory_space<vmem>>, %arg7: memref<1x128xf32, #tpu.memory_space<vmem>>, %arg8: memref<1x128xf32, #tpu.memory_space<vmem>>, %arg9: memref<1x1xf32, #tpu.memory_space<smem>>, %arg10: memref<1x128xf32, #tpu.memory_space<vmem>>) attributes {dimension_semantics = [#tpu.dimension_semantics<parallel>], iteration_bounds = array<i64: 1>, scalar_prefetch = 0 : i64, scratch_operands = 0 : i64, tpu.core_type = #tpu.core_type<tc>, window_params = [{transform_indices = @transform_0, window_bounds = array<i64: 128, 12>}, {transform_indices = @transform_1, window_bounds = array<i64: 128, 4>}, {pipeline_mode = #tpu.pipeline_mode<synchronous>, transform_indices = @transform_2, window_bounds = array<i64: 12, 128>}, {pipeline_mode = #tpu.pipeline_mode<synchronous>, transform_indices = @transform_3, window_bounds = array<i64: 4, 128>}, {pipeline_mode = #tpu.pipeline_mode<synchronous>, transform_indices = @transform_4, window_bounds = array<i64: 1, 128>}, {pipeline_mode = #tpu.pipeline_mode<synchronous>, transform_indices = @transform_5, window_bounds = array<i64: 128, 128>}, {pipeline_mode = #tpu.pipeline_mode<synchronous>, transform_indices = @transform_6, window_bounds = array<i64: 1, 128>}, {pipeline_mode = #tpu.pipeline_mode<synchronous>, transform_indices = @transform_7, window_bounds = array<i64: 1, 128>}, {transform_indices = @transform_8, window_bounds = array<i64: 1, 1>}, {transform_indices = @transform_9, window_bounds = array<i64: 1, 128>}]} {
    %c0 = arith.constant 0 : index
    %c0_0 = arith.constant 0 : index
    %0 = vector.load %arg1[%c0, %c0_0] : memref<128x12xf32, #tpu.memory_space<vmem>>, vector<128x12xf32>
    %c0_1 = arith.constant 0 : index
    %c0_2 = arith.constant 0 : index
    %1 = vector.load %arg3[%c0_1, %c0_2] : memref<12x128xf32, #tpu.memory_space<vmem>>, vector<12x128xf32>
    %cst = arith.constant dense<0.000000e+00> : vector<128x128xf32>
    %2 = tpu.matmul %0, %1, %cst {dimension_numbers = #tpu.dot_dimension_numbers<[1], [0], [0], [1], [0, 0, 1, 1], [], []>} : vector<128x12xf32>, vector<12x128xf32>, vector<128x128xf32> -> vector<128x128xf32>
    %c0_3 = arith.constant 0 : index
    %c0_4 = arith.constant 0 : index
    %3 = vector.load %arg2[%c0_3, %c0_4] : memref<128x4xf32, #tpu.memory_space<vmem>>, vector<128x4xf32>
    %c0_5 = arith.constant 0 : index
    %c0_6 = arith.constant 0 : index
    %4 = vector.load %arg4[%c0_5, %c0_6] : memref<4x128xf32, #tpu.memory_space<vmem>>, vector<4x128xf32>
    %cst_7 = arith.constant dense<0.000000e+00> : vector<128x128xf32>
    %5 = tpu.matmul %3, %4, %cst_7 {dimension_numbers = #tpu.dot_dimension_numbers<[1], [0], [0], [1], [0, 0, 1, 1], [], []>} : vector<128x4xf32>, vector<4x128xf32>, vector<128x128xf32> -> vector<128x128xf32>
    %6 = arith.addf %2, %5 : vector<128x128xf32>
    %c0_8 = arith.constant 0 : index
    %c0_9 = arith.constant 0 : index
    %7 = vector.load %arg5[%c0_8, %c0_9] : memref<1x128xf32, #tpu.memory_space<vmem>>, vector<1x128xf32>
    %8 = vector.broadcast %7 : vector<1x128xf32> to vector<128x128xf32>
    %9 = arith.addf %6, %8 : vector<128x128xf32>
    %cst_10 = arith.constant 0.000000e+00 : f32
    %10 = vector.broadcast %cst_10 : f32 to vector<128x128xf32>
    %11 = arith.maximumf %9, %10 : vector<128x128xf32>
    %c0_11 = arith.constant 0 : index
    %c0_12 = arith.constant 0 : index
    %12 = vector.load %arg6[%c0_11, %c0_12] : memref<128x128xf32, #tpu.memory_space<vmem>>, vector<128x128xf32>
    %cst_13 = arith.constant dense<0.000000e+00> : vector<128x128xf32>
    %13 = tpu.matmul %11, %12, %cst_13 {dimension_numbers = #tpu.dot_dimension_numbers<[1], [0], [0], [1], [0, 0, 1, 1], [], []>} : vector<128x128xf32>, vector<128x128xf32>, vector<128x128xf32> -> vector<128x128xf32>
    %c0_14 = arith.constant 0 : index
    %c0_15 = arith.constant 0 : index
    %14 = vector.load %arg7[%c0_14, %c0_15] : memref<1x128xf32, #tpu.memory_space<vmem>>, vector<1x128xf32>
    %15 = vector.broadcast %14 : vector<1x128xf32> to vector<128x128xf32>
    %16 = arith.addf %13, %15 : vector<128x128xf32>
    %cst_16 = arith.constant 0.000000e+00 : f32
    %17 = vector.broadcast %cst_16 : f32 to vector<128x128xf32>
    %18 = arith.maximumf %16, %17 : vector<128x128xf32>
    %c0_17 = arith.constant 0 : index
    %c0_18 = arith.constant 0 : index
    %19 = vector.load %arg8[%c0_17, %c0_18] : memref<1x128xf32, #tpu.memory_space<vmem>>, vector<1x128xf32>
    %20 = vector.broadcast %19 : vector<1x128xf32> to vector<128x128xf32>
    %21 = arith.mulf %18, %20 : vector<128x128xf32>
    %cst_19 = arith.constant dense<0.000000e+00> : vector<128xf32>
    %22 = vector.multi_reduction <add>, %21, %cst_19 [1] : vector<128x128xf32> to vector<128xf32>
    %c0_20 = arith.constant 0 : index
    %c0_21 = arith.constant 0 : index
    %23 = memref.load %arg9[%c0_20, %c0_21] : memref<1x1xf32, #tpu.memory_space<smem>>
    %24 = vector.broadcast %23 : f32 to vector<128xf32>
    %25 = arith.addf %22, %24 : vector<128xf32>
    %26 = vector.shape_cast %25 : vector<128xf32> to vector<1x128xf32>
    %c0_22 = arith.constant 0 : index
    %c0_23 = arith.constant 0 : index
    %27 = vector.load %arg10[%c0_22, %c0_23] : memref<1x128xf32, #tpu.memory_space<vmem>>, vector<1x128xf32>
    tpu.vector_store %arg10[%c0_22, %c0_23], %26 {strides = array<i32>} : memref<1x128xf32, #tpu.memory_space<vmem>>, vector<1x128xf32>,
    return
  }
  func.func @transform_0(%arg0: i32) -> (i32, i32) {
    %c0_i32 = arith.constant 0 : i32
    %c0_i32_0 = arith.constant 0 : i32
    return %arg0, %c0_i32 : i32, i32
  }
  func.func @transform_1(%arg0: i32) -> (i32, i32) {
    %c0_i32 = arith.constant 0 : i32
    %c0_i32_0 = arith.constant 0 : i32
    return %arg0, %c0_i32 : i32, i32
  }
  func.func @transform_2(%arg0: i32) -> (i32, i32) {
    %c0_i32 = arith.constant 0 : i32
    %c0_i32_0 = arith.constant 0 : i32
    %c0_i32_1 = arith.constant 0 : i32
    return %c0_i32, %c0_i32_0 : i32, i32
  }
  func.func @transform_3(%arg0: i32) -> (i32, i32) {
    %c0_i32 = arith.constant 0 : i32
    %c0_i32_0 = arith.constant 0 : i32
    %c0_i32_1 = arith.constant 0 : i32
    return %c0_i32, %c0_i32_0 : i32, i32
  }
  func.func @transform_4(%arg0: i32) -> (i32, i32) {
    %c0_i32 = arith.constant 0 : i32
    %c0_i32_0 = arith.constant 0 : i32
    %c0_i32_1 = arith.constant 0 : i32
    return %c0_i32, %c0_i32_0 : i32, i32
  }
  func.func @transform_5(%arg0: i32) -> (i32, i32) {
    %c0_i32 = arith.constant 0 : i32
    %c0_i32_0 = arith.constant 0 : i32
    %c0_i32_1 = arith.constant 0 : i32
    return %c0_i32, %c0_i32_0 : i32, i32
  }
  func.func @transform_6(%arg0: i32) -> (i32, i32) {
    %c0_i32 = arith.constant 0 : i32
    %c0_i32_0 = arith.constant 0 : i32
    %c0_i32_1 = arith.constant 0 : i32
    return %c0_i32, %c0_i32_0 : i32, i32
  }
  func.func @transform_7(%arg0: i32) -> (i32, i32) {
    %c0_i32 = arith.constant 0 : i32
    %c0_i32_0 = arith.constant 0 : i32
    %c0_i32_1 = arith.constant 0 : i32
    return %c0_i32, %c0_i32_0 : i32, i32
  }
  func.func @transform_8(%arg0: i32) -> (i32, i32) {
    %c0_i32 = arith.constant 0 : i32
    %c0_i32_0 = arith.constant 0 : i32
    %c0_i32_1 = arith.constant 0 : i32
    return %c0_i32, %c0_i32_0 : i32, i32
  }
  func.func @transform_9(%arg0: i32) -> (i32, i32) {
    %c0_i32 = arith.constant 0 : i32
    %c0_i32_0 = arith.constant 0 : i32
    return %arg0, %c0_i32 : i32, i32
  }
}

</mosaic_0001>

<bundles_post_ra>
// kernel: soft_q_forward.1
= control target key start
LH: loop header
LB: loop body
LE: loop exit
PB: predicated region body
PF: predicated region fallthrough
CT: control target
= control target key end

     0   :  { %vm117_vm0 = vcmask 1043456   ;;  %vm68_vm1 = vcmask 31744   ;;  %vm186_vm2 = vcmask 97280   ;;  %vm531_vm3 = vcmask 130112   ;;  %s995_s2 = inlined_call_operand.vmem [shape: f32[12,128], index: 2, kind: input, shape index: {}]   ;;  %s996_s3 = inlined_call_operand.vmem [shape: f32[4,128], index: 3, kind: input, shape index: {}]   ;;  %s997_s1 = inlined_call_operand.vmem [shape: f32[128,4], index: 1, kind: input, shape index: {}]   ;;  %s998_s0 = inlined_call_operand.vmem [shape: f32[128,12], index: 0, kind: input, shape index: {}]   ;;  %s999_s4 = inlined_call_operand.vmem [shape: f32[1,128], index: 4, kind: input, shape index: {}]   ;;  %s1000_s5 = inlined_call_operand.vmem [shape: f32[128,128], index: 5, kind: input, shape index: {}]   ;;  %s1001_s6 = inlined_call_operand.vmem [shape: f32[1,128], index: 6, kind: input, shape index: {}]   ;;  %s1002_s7 = inlined_call_operand.vmem [shape: f32[1,128], index: 7, kind: input, shape index: {}]   ;;  %s1003_s8 = inlined_call_operand.<no memory space> [shape: f32[1,1], index: 8, kind: input, shape index: {}]   ;;  %s1004_s9 = inlined_call_operand.vmem [shape: f32[1,128], index: 9, kind: output, shape index: {}]  }
   0x1   :  { %v50_v0 = vld [vmem:[%s995_s2 + $0x8] sm:$0xf]  ;;  %v67_v1 = vld [vmem:[%s996_s3] sm:$0xf]  ;;  %v53_v7 = vld [vmem:[%s997_s1 + $0x10] sm:$0xff]  ;;  %vm535_vm4 = vcmask 195712  }
   0x2   :  { %v49_v2 = vld [vmem:[%s995_s2] sm:$0xff]  ;;  %612 = vmatpush.msk.msra.mxu1 %vm117_vm0, %v50_v0  ;;  %595 = vmatpush.msk.msra.mxu0 %vm117_vm0, %v67_v1  ;;  %v52_v5 = vld [vmem:[%s997_s1 + $0x8] sm:$0xff]  ;;  %v35_v8 = vld [vmem:[%s998_s0 + $0x10] sm:$0xff]  ;;  %vm539_vm5 = vcmask 261312   ;;  %vm543_vm6 = vcmask 326912   ;;  %vm547_vm7 = vcmask 392512  }
   0x3   :  { %v51_v3 = vld [vmem:[%s997_s1] sm:$0xff]  ;;  %v34_v6 = vld [vmem:[%s998_s0 + $0x8] sm:$0xff]  ;;  %v54_v9 = vld [vmem:[%s997_s1 + $0x18] sm:$0xff]  ;;  %vm551_vm8 = vcmask 458112   ;;  %vm555_vm9 = vcmask 523712   ;;  %vm559_vm10 = vcmask 589312  }
   0x4   :  { %v33_v4 = vld [vmem:[%s998_s0] sm:$0xff]  ;;  %596 = vmatmul.msk.f32.vlgmr.msra.gmra.mxu0 %vm68_vm1, %v51_v3  ;;  %253 = vmatpush.msra.mxu1 %v49_v2  ;;  %v36_v10 = vld [vmem:[%s998_s0 + $0x18] sm:$0xff]  ;;  %v56_v13 = vld [vmem:[%s997_s1 + $0x28] sm:$0xff]  ;;  %vm563_vm11 = vcmask 654912   ;;  %vm567_vm12 = vcmask 720512   ;;  %vm571_vm13 = vcmask 786112  }
   0x5   :  { %613 = vmatmul.msk.f32.vlgmr.msra.gmra.mxu1 %vm186_vm2, %v33_v4  ;;  %v55_v11 = vld [vmem:[%s997_s1 + $0x20] sm:$0xff]  ;;  %v38_v14 = vld [vmem:[%s998_s0 + $0x28] sm:$0xff]  ;;  %v57_v15 = vld [vmem:[%s997_s1 + $0x30] sm:$0xff]  ;;  %vm575_vm14 = vcmask 851712   ;;  %vm579_vm15 = vcmask 917312   ;;  %vm583_vm0 = vcmask 982912  }
   0x6   :  { %v37_v12 = vld [vmem:[%s998_s0 + $0x20] sm:$0xff]  ;;  %v39_v16 = vld [vmem:[%s998_s0 + $0x30] sm:$0xff]  ;;  %v58_v17 = vld [vmem:[%s997_s1 + $0x38] sm:$0xff] }
   0x7   :  { %v40_v18 = vld [vmem:[%s998_s0 + $0x38] sm:$0xff]  ;;  %v59_v19 = vld [vmem:[%s997_s1 + $0x40] sm:$0xff]  ;;  %v353_v22 = vld [vmem:[%s1000_s5 + $0x70] sm:$0xff] }
   0x8   :  { %v41_v20 = vld [vmem:[%s998_s0 + $0x40] sm:$0xff]  ;;  %v354_v21 = vld [vmem:[%s1000_s5 + $0x78] sm:$0xff]  ;;  %v60_v23 = vld [vmem:[%s997_s1 + $0x48] sm:$0xff] }
   0x9   :  { %359 = vmatpush.msra.mxu2 %v354_v21  ;;  %629 = vmatpush.msra.mxu3 %v354_v21  ;;  %v42_v24 = vld [vmem:[%s998_s0 + $0x48] sm:$0xff]  ;;  %v351_v26 = vld [vmem:[%s1000_s5 + $0x60] sm:$0xff]  ;;  %v350_v27 = vld [vmem:[%s1000_s5 + $0x58] sm:$0xff] }
   0xa   :  { %v352_v25 = vld [vmem:[%s1000_s5 + $0x68] sm:$0xff]  ;;  %v61_v28 = vld [vmem:[%s997_s1 + $0x50] sm:$0xff]  ;;  %v347_v32 = vld [vmem:[%s1000_s5 + $0x40] sm:$0xff] }
   0xb   :  { %360 = vmatpush.msra.mxu2 %v353_v22  ;;  %630 = vmatpush.msra.mxu3 %v353_v22  ;;  %v349_v29 = vld [vmem:[%s1000_s5 + $0x50] sm:$0xff]  ;;  %v348_v31 = vld [vmem:[%s1000_s5 + $0x48] sm:$0xff]  ;;  %v346_v33 = vld [vmem:[%s1000_s5 + $0x38] sm:$0xff] }
   0xc   :  { %597 = vmatmul.msk.f32.gmra.mxu0 %vm68_vm1, %v52_v5  ;;  %v43_v30 = vld [vmem:[%s998_s0 + $0x50] sm:$0xff]  ;;  %v62_v34 = vld [vmem:[%s997_s1 + $0x58] sm:$0xff]  ;;  %v344_v37 = vld [vmem:[%s1000_s5 + $0x28] sm:$0xff] }
   0xd   :  { %614 = vmatmul.msk.f32.gmra.mxu1 %vm186_vm2, %v34_v6  ;;  %361 = vmatpush.msra.mxu2 %v352_v25  ;;  %v345_v35 = vld [vmem:[%s1000_s5 + $0x30] sm:$0xff]  ;;  %v44_v36 = vld [vmem:[%s998_s0 + $0x58] sm:$0xff]  ;;  %v343_v38 = vld [vmem:[%s1000_s5 + $0x20] sm:$0xff] }
   0xe   :  { %631 = vmatpush.msra.mxu3 %v352_v25  ;;  %v63_v39 = vld [vmem:[%s997_s1 + $0x60] sm:$0xff]  ;;  %v342_v40 = vld [vmem:[%s1000_s5 + $0x18] sm:$0xff]  ;;  %v341_v42 = vld [vmem:[%s1000_s5 + $0x10] sm:$0xff] }
   0xf   :  { %362 = vmatpush.msra.mxu2 %v351_v26  ;;  %v45_v41 = vld [vmem:[%s998_s0 + $0x60] sm:$0xff]  ;;  %v340_v43 = vld [vmem:[%s1000_s5 + $0x8] sm:$0xff]  ;;  %v65_v47 = vld [vmem:[%s997_s1 + $0x70] sm:$0xff] }
  0x10   :  { %632 = vmatpush.msra.mxu3 %v351_v26  ;;  %v339_v44 = vld [vmem:[%s1000_s5] sm:$0xff]  ;;  %v64_v45 = vld [vmem:[%s997_s1 + $0x68] sm:$0xff]  ;;  %v47_v48 = vld [vmem:[%s998_s0 + $0x70] sm:$0xff] }
  0x11   :  { %363 = vmatpush.msra.mxu2 %v350_v27  ;;  %v46_v46 = vld [vmem:[%s998_s0 + $0x68] sm:$0xff]  ;;  %v66_v49 = vld [vmem:[%s997_s1 + $0x78] sm:$0xff]  ;;  %v886_v52 = vld [vmem:[%s999_s4] ss:$0 sm:$0xff] }
  0x12   :  { %633 = vmatpush.msra.mxu3 %v350_v27  ;;  %v48_v50 = vld [vmem:[%s998_s0 + $0x78] sm:$0xff] }
  0x13   :  { %364 = vmatpush.msra.mxu2 %v349_v29 }
  0x14   :  { %598 = vmatmul.msk.f32.gmra.mxu0 %vm68_vm1, %v53_v7  ;;  %634 = vmatpush.msra.mxu3 %v349_v29 }
  0x15   :  { %615 = vmatmul.msk.f32.gmra.mxu1 %vm186_vm2, %v35_v8  ;;  %365 = vmatpush.msra.mxu2 %v348_v31 }
  0x16   :  { %635 = vmatpush.msra.mxu3 %v348_v31 }
  0x17   :  { %366 = vmatpush.msra.mxu2 %v347_v32 }
  0x18   :  { %636 = vmatpush.msra.mxu3 %v347_v32 }
  0x19   :  { %367 = vmatpush.msra.mxu2 %v346_v33 }
  0x1a   :  { %637 = vmatpush.msra.mxu3 %v346_v33 }
  0x1b   :  { %368 = vmatpush.msra.mxu2 %v345_v35 }
  0x1c   :  { %599 = vmatmul.msk.f32.gmra.mxu0 %vm68_vm1, %v54_v9  ;;  %638 = vmatpush.msra.mxu3 %v345_v35 }
  0x1d   :  { %616 = vmatmul.msk.f32.gmra.mxu1 %vm186_vm2, %v36_v10  ;;  %369 = vmatpush.msra.mxu2 %v344_v37 }
  0x1e   :  { %639 = vmatpush.msra.mxu3 %v344_v37 }
  0x1f   :  { %370 = vmatpush.msra.mxu2 %v343_v38 }
  0x20   :  { %640 = vmatpush.msra.mxu3 %v343_v38 }
  0x21   :  { %371 = vmatpush.msra.mxu2 %v342_v40 }
  0x22   :  { %641 = vmatpush.msra.mxu3 %v342_v40 }
  0x23   :  { %372 = vmatpush.msra.mxu2 %v341_v42 }
  0x24   :  { %600 = vmatmul.msk.f32.gmra.mxu0 %vm68_vm1, %v55_v11  ;;  %642 = vmatpush.msra.mxu3 %v341_v42 }
  0x25   :  { %617 = vmatmul.msk.f32.gmra.mxu1 %vm186_vm2, %v37_v12  ;;  %373 = vmatpush.msra.mxu2 %v340_v43 }
  0x26   :  { %643 = vmatpush.msra.mxu3 %v340_v43 }
  0x27   :  { %374 = vmatpush.msra.mxu2 %v339_v44 }
  0x28   :  { %644 = vmatpush.msra.mxu3 %v339_v44 }
  0x2c   :  { %601 = vmatmul.msk.f32.gmra.mxu0 %vm68_vm1, %v56_v13 }
  0x2d   :  { %618 = vmatmul.msk.f32.gmra.mxu1 %vm186_vm2, %v38_v14 }
  0x34   :  { %602 = vmatmul.msk.f32.gmra.mxu0 %vm68_vm1, %v57_v15 }
  0x35   :  { %619 = vmatmul.msk.f32.gmra.mxu1 %vm186_vm2, %v39_v16 }
  0x3c   :  { %603 = vmatmul.msk.f32.gmra.mxu0 %vm68_vm1, %v58_v17 }
  0x3d   :  { %620 = vmatmul.msk.f32.gmra.mxu1 %vm186_vm2, %v40_v18 }
  0x44   :  { %604 = vmatmul.msk.f32.gmra.mxu0 %vm68_vm1, %v59_v19 }
  0x45   :  { %621 = vmatmul.msk.f32.gmra.mxu1 %vm186_vm2, %v41_v20 }
  0x4c   :  { %605 = vmatmul.msk.f32.gmra.mxu0 %vm68_vm1, %v60_v23 }
  0x4d   :  { %622 = vmatmul.msk.f32.gmra.mxu1 %vm186_vm2, %v42_v24 }
  0x54   :  { %606 = vmatmul.msk.f32.gmra.mxu0 %vm68_vm1, %v61_v28 }
  0x55   :  { %623 = vmatmul.msk.f32.gmra.mxu1 %vm186_vm2, %v43_v30 }
  0x5c   :  { %607 = vmatmul.msk.f32.gmra.mxu0 %vm68_vm1, %v62_v34 }
  0x5d   :  { %624 = vmatmul.msk.f32.gmra.mxu1 %vm186_vm2, %v44_v36 }
  0x64   :  { %608 = vmatmul.msk.f32.gmra.mxu0 %vm68_vm1, %v63_v39 }
  0x65   :  { %625 = vmatmul.msk.f32.gmra.mxu1 %vm186_vm2, %v45_v41 }
  0x6c   :  { %609 = vmatmul.msk.f32.gmra.mxu0 %vm68_vm1, %v64_v45 }
  0x6d   :  { %626 = vmatmul.msk.f32.gmra.mxu1 %vm186_vm2, %v46_v46 }
  0x74   :  { %610 = vmatmul.msk.f32.gmra.mxu0 %vm68_vm1, %v65_v47 }
  0x75   :  { %627 = vmatmul.msk.f32.gmra.mxu1 %vm186_vm2, %v47_v48 }
  0x7c   :  { %611 = vmatmul.msk.f32.gmra.mxu0 %vm68_vm1, %v66_v49  ;;  %vm587_vm1 = vcmask 1048512  }
  0x7d   :  { %628 = vmatmul.msk.f32.gmra.mxu1 %vm186_vm2, %v48_v50 }
  0x81   :  { %v138_v51 = vpop.f32.mrf.mxu0 }
  0x82   :  { %v255_v53 = vpop.f32.mrf.mxu1 }
  0x83   :  { %v256_v54 = vadd.f32 %v255_v53, %v138_v51 }
  0x85   :  { %v307_v55 = vadd.f32 %v886_v52, %v256_v54 }
  0x87   :  { %v323_v56 = vmax.f32 %v307_v55, 0.0 }
  0x89   :  { %v141_v57 = vpop.f32.mrf.mxu0  ;;  %375 = vmatmul.f32.vlgmr.msra.gmra.mxu2 %v323_v56 }
  0x8a   :  { %v258_v58 = vpop.f32.mrf.mxu1 }
  0x8b   :  { %v259_v59 = vadd.f32 %v258_v58, %v141_v57 }
  0x8d   :  { %v308_v60 = vadd.f32 %v886_v52, %v259_v59 }
  0x8f   :  { %v324_v61 = vmax.f32 %v308_v60, 0.0 }
  0x91   :  { %v144_v62 = vpop.f32.mrf.mxu0  ;;  %378 = vmatmul.f32.gmra.mxu2 %v324_v61 }
  0x92   :  { %v261_v63 = vpop.f32.mrf.mxu1 }
  0x93   :  { %v262_v0 = vadd.f32 %v261_v63, %v144_v62 }
  0x95   :  { %v309_v1 = vadd.f32 %v886_v52, %v262_v0 }
  0x97   :  { %v325_v2 = vmax.f32 %v309_v1, 0.0 }
  0x99   :  { %v147_v3 = vpop.f32.mrf.mxu0  ;;  %381 = vmatmul.f32.gmra.mxu2 %v325_v2 }
  0x9a   :  { %v264_v4 = vpop.f32.mrf.mxu1 }
  0x9b   :  { %v265_v5 = vadd.f32 %v264_v4, %v147_v3 }
  0x9d   :  { %v310_v6 = vadd.f32 %v886_v52, %v265_v5  ;;  %v907_v5 = vld [vmem:[%s1001_s6] ss:$0 sm:$0xff] }
  0x9f   :  { %v326_v7 = vmax.f32 %v310_v6, 0.0 }
  0xa1   :  { %v150_v8 = vpop.f32.mrf.mxu0  ;;  %384 = vmatmul.f32.gmra.mxu2 %v326_v7 }
  0xa2   :  { %v267_v9 = vpop.f32.mrf.mxu1 }
  0xa3   :  { %v268_v10 = vadd.f32 %v267_v9, %v150_v8  ;;  %v913_v8 = vld [vmem:[%s1002_s7] ss:$0 sm:$0xff] }
  0xa5   :  { %v311_v11 = vadd.f32 %v886_v52, %v268_v10 }
  0xa7   :  { %v327_v12 = vmax.f32 %v311_v11, 0.0 }
  0xa9   :  { %v153_v13 = vpop.f32.mrf.mxu0  ;;  %387 = vmatmul.f32.gmra.mxu2 %v327_v12 }
  0xaa   :  { %v270_v14 = vpop.f32.mrf.mxu1 }
  0xab   :  { %v271_v15 = vadd.f32 %v270_v14, %v153_v13 }
  0xad   :  { %v312_v16 = vadd.f32 %v886_v52, %v271_v15 }
  0xaf   :  { %v328_v17 = vmax.f32 %v312_v16, 0.0 }
  0xb1   :  { %v156_v18 = vpop.f32.mrf.mxu0  ;;  %390 = vmatmul.f32.gmra.mxu2 %v328_v17 }
  0xb2   :  { %v273_v19 = vpop.f32.mrf.mxu1 }
  0xb3   :  { %v274_v20 = vadd.f32 %v273_v19, %v156_v18 }
  0xb5   :  { %v313_v21 = vadd.f32 %v886_v52, %v274_v20 }
  0xb7   :  { %v329_v22 = vmax.f32 %v313_v21, 0.0 }
  0xb9   :  { %v159_v23 = vpop.f32.mrf.mxu0  ;;  %393 = vmatmul.f32.gmra.mxu2 %v329_v22 }
  0xba   :  { %v276_v24 = vpop.f32.mrf.mxu1 }
  0xbb   :  { %v277_v25 = vadd.f32 %v276_v24, %v159_v23 }
  0xbd   :  { %v314_v26 = vadd.f32 %v886_v52, %v277_v25 }
  0xbf   :  { %v330_v27 = vmax.f32 %v314_v26, 0.0 }
  0xc1   :  { %v162_v28 = vpop.f32.mrf.mxu0  ;;  %396 = vmatmul.f32.gmra.mxu2 %v330_v27 }
  0xc2   :  { %v279_v29 = vpop.f32.mrf.mxu1 }
  0xc3   :  { %v280_v30 = vadd.f32 %v279_v29, %v162_v28 }
  0xc5   :  { %v315_v31 = vadd.f32 %v886_v52, %v280_v30 }
  0xc7   :  { %v331_v32 = vmax.f32 %v315_v31, 0.0 }
  0xc9   :  { %v165_v33 = vpop.f32.mrf.mxu0  ;;  %399 = vmatmul.f32.gmra.mxu2 %v331_v32 }
  0xca   :  { %v282_v34 = vpop.f32.mrf.mxu1 }
  0xcb   :  { %v283_v35 = vadd.f32 %v282_v34, %v165_v33 }
  0xcd   :  { %v316_v36 = vadd.f32 %v886_v52, %v283_v35 }
  0xcf   :  { %v332_v37 = vmax.f32 %v316_v36, 0.0 }
  0xd1   :  { %v168_v38 = vpop.f32.mrf.mxu0  ;;  %402 = vmatmul.f32.gmra.mxu2 %v332_v37 }
  0xd2   :  { %v285_v39 = vpop.f32.mrf.mxu1 }
  0xd3   :  { %v286_v40 = vadd.f32 %v285_v39, %v168_v38 }
  0xd5   :  { %v317_v41 = vadd.f32 %v886_v52, %v286_v40 }
  0xd7   :  { %v333_v42 = vmax.f32 %v317_v41, 0.0 }
  0xd9   :  { %v171_v43 = vpop.f32.mrf.mxu0  ;;  %405 = vmatmul.f32.gmra.mxu2 %v333_v42 }
  0xda   :  { %v288_v44 = vpop.f32.mrf.mxu1 }
  0xdb   :  { %v289_v45 = vadd.f32 %v288_v44, %v171_v43 }
  0xdd   :  { %v318_v46 = vadd.f32 %v886_v52, %v289_v45 }
  0xdf   :  { %v334_v47 = vmax.f32 %v318_v46, 0.0 }
  0xe1   :  { %v174_v48 = vpop.f32.mrf.mxu0  ;;  %408 = vmatmul.f32.vlgmr.msra.gmra.mxu3 %v334_v47 }
  0xe2   :  { %v291_v49 = vpop.f32.mrf.mxu1 }
  0xe3   :  { %v292_v50 = vadd.f32 %v291_v49, %v174_v48 }
  0xe5   :  { %v319_v51 = vadd.f32 %v886_v52, %v292_v50 }
  0xe7   :  { %v335_v53 = vmax.f32 %v319_v51, 0.0 }
  0xe9   :  { %v177_v54 = vpop.f32.mrf.mxu0  ;;  %411 = vmatmul.f32.gmra.mxu3 %v335_v53 }
  0xea   :  { %v294_v55 = vpop.f32.mrf.mxu1 }
  0xeb   :  { %v295_v56 = vadd.f32 %v294_v55, %v177_v54 }
  0xed   :  { %v320_v57 = vadd.f32 %v886_v52, %v295_v56 }
  0xef   :  { %v336_v58 = vmax.f32 %v320_v57, 0.0 }
  0xf1   :  { %v180_v59 = vpop.f32.mrf.mxu0  ;;  %414 = vmatmul.f32.gmra.mxu3 %v336_v58 }
  0xf2   :  { %v297_v60 = vpop.f32.mrf.mxu1 }
  0xf3   :  { %v298_v61 = vadd.f32 %v297_v60, %v180_v59 }
  0xf5   :  { %v321_v62 = vadd.f32 %v886_v52, %v298_v61 }
  0xf7   :  { %v337_v63 = vmax.f32 %v321_v62, 0.0 }
  0xf9   :  { %v183_v0 = vpop.f32.mrf.mxu0  ;;  %417 = vmatmul.f32.gmra.mxu3 %v337_v63 }
  0xfa   :  { %v300_v1 = vpop.f32.mrf.mxu1 }
  0xfb   :  { %v301_v2 = vadd.f32 %v300_v1, %v183_v0 }
  0xfd   :  { %v322_v3 = vadd.f32 %v886_v52, %v301_v2 }
  0xff   :  { %v338_v4 = vmax.f32 %v322_v3, 0.0 }
 0x101   :  { %420 = vmatmul.f32.gmra.mxu3 %v338_v4 }
 0x10c   :  { %v376_v6 = vpop.f32.mrf.mxu2 }
 0x10d   :  { %v377_v7 = vadd.f32 %v907_v5, %v376_v6 }
 0x10f   :  { %v424_v9 = vmax.f32 %v377_v7, 0.0 }
 0x111   :  { %v444_v10 = vmul.f32 %v913_v8, %v424_v9 }
 0x113   :  { %460 = vadd.xlane.f32.xlu0 %v444_v10 }
 0x114   :  { %v379_v52 = vpop.f32.mrf.mxu2 }
 0x115   :  { %v380_v11 = vadd.f32 %v907_v5, %v379_v52 }
 0x117   :  { %v425_v12 = vmax.f32 %v380_v11, 0.0 }
 0x119   :  { %v445_v13 = vmul.f32 %v913_v8, %v425_v12 }
 0x11b   :  { %462 = vadd.xlane.f32.xlu0 %v445_v13 }
 0x11c   :  { %v382_v14 = vpop.f32.mrf.mxu2 }
 0x11d   :  { %v383_v15 = vadd.f32 %v907_v5, %v382_v14  ;;  %v526_v14 = vlaneseq }
 0x11f   :  { %v426_v16 = vmax.f32 %v383_v15, 0.0 }
 0x121   :  { %v446_v17 = vmul.f32 %v913_v8, %v426_v16 }
 0x123   :  { %464 = vadd.xlane.f32.xlu1 %v446_v17 }
 0x124   :  { %v385_v18 = vpop.f32.mrf.mxu2 }
 0x125   :  { %v386_v19 = vadd.f32 %v907_v5, %v385_v18  ;;  %v946_v18 = vand.u32 127, %v526_v14 }
 0x127   :  { %v427_v20 = vmax.f32 %v386_v19, 0.0  ;;  %v585_v14 = vadd.s32 4294967176, %v946_v18 }
 0x129   :  { %v447_v21 = vmul.f32 %v913_v8, %v427_v20 }
 0x12b   :  { %466 = vadd.xlane.f32.xlu1 %v447_v21  ;;  %v533_v21 = vadd.s32 4294967280, %v946_v18 }
 0x12c   :  { %v388_v22 = vpop.f32.mrf.mxu2 }
 0x12d   :  { %v389_v23 = vadd.f32 %v907_v5, %v388_v22 }
 0x12f   :  { %v428_v24 = vmax.f32 %v389_v23, 0.0  ;;  %v537_v23 = vadd.s32 4294967272, %v946_v18 }
 0x131   :  { %v448_v25 = vmul.f32 %v913_v8, %v428_v24 }
 0x133   :  { %468 = vadd.xlane.f32.xlu2 %v448_v25 }
 0x134   :  { %v391_v26 = vpop.f32.mrf.mxu2 }
 0x135   :  { %v392_v27 = vadd.f32 %v907_v5, %v391_v26 }
 0x137   :  { %v429_v28 = vmax.f32 %v392_v27, 0.0 }
 0x139   :  { %v449_v29 = vmul.f32 %v913_v8, %v429_v28  ;;  %v541_v28 = vadd.s32 4294967264, %v946_v18 }
 0x13b   :  { %470 = vadd.xlane.f32.xlu2 %v449_v29 }
 0x13c   :  { %v394_v30 = vpop.f32.mrf.mxu2 }
 0x13d   :  { %v395_v31 = vadd.f32 %v907_v5, %v394_v30 }
 0x13f   :  { %v430_v32 = vmax.f32 %v395_v31, 0.0 }
 0x141   :  { %v450_v33 = vmul.f32 %v913_v8, %v430_v32 }
 0x143   :  { %472 = vadd.xlane.f32.xlu0 %v450_v33 }
 0x144   :  { %v397_v34 = vpop.f32.mrf.mxu2 }
 0x145   :  { %v398_v35 = vadd.f32 %v907_v5, %v397_v34  ;;  %v545_v34 = vadd.s32 4294967256, %v946_v18 }
 0x147   :  { %v431_v36 = vmax.f32 %v398_v35, 0.0 }
 0x149   :  { %v451_v37 = vmul.f32 %v913_v8, %v431_v36 }
 0x14b   :  { %474 = vadd.xlane.f32.xlu1 %v451_v37  ;;  %v549_v37 = vadd.s32 4294967248, %v946_v18 }
 0x14c   :  { %v400_v38 = vpop.f32.mrf.mxu2 }
 0x14d   :  { %v401_v39 = vadd.f32 %v907_v5, %v400_v38 }
 0x14f   :  { %v432_v40 = vmax.f32 %v401_v39, 0.0 }
 0x151   :  { %v452_v41 = vmul.f32 %v913_v8, %v432_v40  ;;  %v553_v40 = vadd.s32 4294967240, %v946_v18 }
 0x153   :  { %476 = vadd.xlane.f32.xlu2 %v452_v41 }
 0x154   :  { %v403_v42 = vpop.f32.mrf.mxu2 }
 0x155   :  { %v404_v43 = vadd.f32 %v907_v5, %v403_v42 }
 0x157   :  { %v433_v44 = vmax.f32 %v404_v43, 0.0  ;;  %v557_v43 = vadd.s32 4294967232, %v946_v18 }
 0x159   :  { %v453_v45 = vmul.f32 %v913_v8, %v433_v44 }
 0x15b   :  { %478 = vadd.xlane.f32.xlu0 %v453_v45 }
 0x15c   :  { %v406_v46 = vpop.f32.mrf.mxu2 }
 0x15d   :  { %v407_v47 = vadd.f32 %v907_v5, %v406_v46 }
 0x15f   :  { %v434_v48 = vmax.f32 %v407_v47, 0.0  ;;  %v561_v47 = vadd.s32 4294967224, %v946_v18 }
 0x161   :  { %v454_v49 = vmul.f32 %v913_v8, %v434_v48 }
 0x163   :  { %480 = vadd.xlane.f32.xlu1 %v454_v49 }
 0x164   :  { %v409_v50 = vpop.f32.mrf.mxu3 }
 0x165   :  { %v410_v51 = vadd.f32 %v907_v5, %v409_v50 }
 0x167   :  { %v435_v53 = vmax.f32 %v410_v51, 0.0  ;;  %v565_v51 = vadd.s32 4294967216, %v946_v18 }
 0x169   :  { %v455_v54 = vmul.f32 %v913_v8, %v435_v53 }
 0x16b   :  { %482 = vadd.xlane.f32.xlu2 %v455_v54 }
 0x16c   :  { %v412_v55 = vpop.f32.mrf.mxu3 }
 0x16d   :  { %v413_v56 = vadd.f32 %v907_v5, %v412_v55 }
 0x16f   :  { %v436_v57 = vmax.f32 %v413_v56, 0.0 }
 0x171   :  { %v456_v58 = vmul.f32 %v913_v8, %v436_v57  ;;  %v569_v57 = vadd.s32 4294967208, %v946_v18 }
 0x173   :  { %484 = vadd.xlane.f32.xlu0 %v456_v58 }
 0x174   :  { %v415_v59 = vpop.f32.mrf.mxu3 }
 0x175   :  { %v416_v60 = vadd.f32 %v907_v5, %v415_v59 }
 0x177   :  { %v437_v61 = vmax.f32 %v416_v60, 0.0 }
 0x179   :  { %v457_v62 = vmul.f32 %v913_v8, %v437_v61  ;;  %v573_v61 = vadd.s32 4294967200, %v946_v18 }
 0x17b   :  { %486 = vadd.xlane.f32.xlu1 %v457_v62 }
 0x17c   :  { %v418_v63 = vpop.f32.mrf.mxu3 }
 0x17d   :  { %v419_v0 = vadd.f32 %v907_v5, %v418_v63 }
 0x17f   :  { %v438_v1 = vmax.f32 %v419_v0, 0.0 }
 0x181   :  { %v458_v2 = vmul.f32 %v913_v8, %v438_v1  ;;  %v577_v1 = vadd.s32 4294967192, %v946_v18 }
 0x183   :  { %488 = vadd.xlane.f32.xlu2 %v458_v2 }
 0x184   :  { %v421_v3 = vpop.f32.mrf.mxu3 }
 0x185   :  { %v422_v4 = vadd.f32 %v907_v5, %v421_v3  ;;  %v951_v5 = vstv %s1003_s8 }
 0x186   :  { %v461_v9 = vpop.xlane.xlu0 %460 }
 0x187   :  { %v439_v6 = vmax.f32 %v422_v4, 0.0  ;;  %v494_v20 = vadd.f32 %v951_v5, %v461_v9 }
 0x189   :  { %v459_v7 = vmul.f32 %v913_v8, %v439_v6  ;;  %v529_v8 = vadd.s32 4294967288, %v946_v18  ;;  %v528_v31 = vperm.slane %v494_v20, %v946_v18  ;;  %v581_v6 = vadd.s32 4294967184, %v946_v18 }
 0x18b   :  { %490 = vadd.xlane.f32.xlu0 %v459_v7 }
 0x18e   :  { %v463_v11 = vpop.xlane.xlu0 %462 }
 0x18f   :  { %v495_v19 = vadd.f32 %v951_v5, %v463_v11 }
 0x191   :  { %v530_v26 = vperm.slane %v495_v19, %v529_v8 }
 0x193   :  { %v532_v36 = vsel %vm531_vm3, %v530_v26, %v528_v31 }
 0x196   :  { %v465_v10 = vpop.xlane.xlu1 %464 }
 0x197   :  { %v496_v22 = vadd.f32 %v951_v5, %v465_v10 }
 0x199   :  { %v534_v32 = vperm.slane %v496_v22, %v533_v21 }
 0x19b   :  { %v536_v42 = vsel %vm535_vm4, %v534_v32, %v532_v36 }
 0x19e   :  { %v467_v12 = vpop.xlane.xlu1 %466 }
 0x19f   :  { %v497_v24 = vadd.f32 %v951_v5, %v467_v12 }
 0x1a1   :  { %v538_v33 = vperm.slane %v497_v24, %v537_v23 }
 0x1a3   :  { %v540_v45 = vsel %vm539_vm5, %v538_v33, %v536_v42 }
 0x1a6   :  { %v469_v52 = vpop.xlane.xlu2 %468 }
 0x1a7   :  { %v498_v29 = vadd.f32 %v951_v5, %v469_v52 }
 0x1a9   :  { %v542_v39 = vperm.slane %v498_v29, %v541_v28 }
 0x1ab   :  { %v544_v55 = vsel %vm543_vm6, %v542_v39, %v540_v45 }
 0x1ae   :  { %v471_v13 = vpop.xlane.xlu2 %470 }
 0x1af   :  { %v499_v35 = vadd.f32 %v951_v5, %v471_v13 }
 0x1b1   :  { %v546_v46 = vperm.slane %v499_v35, %v545_v34 }
 0x1b3   :  { %v548_v63 = vsel %vm547_vm7, %v546_v46, %v544_v55 }
 0x1b6   :  { %v473_v15 = vpop.xlane.xlu0 %472 }
 0x1b7   :  { %v500_v38 = vadd.f32 %v951_v5, %v473_v15 }
 0x1b9   :  { %v550_v50 = vperm.slane %v500_v38, %v549_v37 }
 0x1bb   :  { %v552_v3 = vsel %vm551_vm8, %v550_v50, %v548_v63 }
 0x1be   :  { %v475_v16 = vpop.xlane.xlu1 %474 }
 0x1bf   :  { %v501_v41 = vadd.f32 %v951_v5, %v475_v16 }
 0x1c1   :  { %v554_v56 = vperm.slane %v501_v41, %v553_v40 }
 0x1c3   :  { %v556_v9 = vsel %vm555_vm9, %v554_v56, %v552_v3 }
 0x1c6   :  { %v477_v17 = vpop.xlane.xlu2 %476 }
 0x1c7   :  { %v502_v44 = vadd.f32 %v951_v5, %v477_v17 }
 0x1c9   :  { %v558_v60 = vperm.slane %v502_v44, %v557_v43 }
 0x1cb   :  { %v560_v52 = vsel %vm559_vm10, %v558_v60, %v556_v9 }
 0x1ce   :  { %v479_v25 = vpop.xlane.xlu0 %478 }
 0x1cf   :  { %v503_v48 = vadd.f32 %v951_v5, %v479_v25 }
 0x1d1   :  { %v562_v0 = vperm.slane %v503_v48, %v561_v47 }
 0x1d3   :  { %v564_v12 = vsel %vm563_vm11, %v562_v0, %v560_v52 }
 0x1d6   :  { %v481_v27 = vpop.xlane.xlu1 %480 }
 0x1d7   :  { %v504_v53 = vadd.f32 %v951_v5, %v481_v27 }
 0x1d9   :  { %v566_v4 = vperm.slane %v504_v53, %v565_v51 }
 0x1db   :  { %v568_v15 = vsel %vm567_vm12, %v566_v4, %v564_v12 }
 0x1de   :  { %v483_v30 = vpop.xlane.xlu2 %482 }
 0x1df   :  { %v505_v58 = vadd.f32 %v951_v5, %v483_v30 }
 0x1e1   :  { %v570_v10 = vperm.slane %v505_v58, %v569_v57 }
 0x1e3   :  { %v572_v8 = vsel %vm571_vm13, %v570_v10, %v568_v15 }
 0x1e6   :  { %v485_v49 = vpop.xlane.xlu0 %484 }
 0x1e7   :  { %v506_v62 = vadd.f32 %v951_v5, %v485_v49 }
 0x1e9   :  { %v574_v11 = vperm.slane %v506_v62, %v573_v61 }
 0x1eb   :  { %v576_v20 = vsel %vm575_vm14, %v574_v11, %v572_v8 }
 0x1ee   :  { %v487_v54 = vpop.xlane.xlu1 %486 }
 0x1ef   :  { %v507_v2 = vadd.f32 %v951_v5, %v487_v54 }
 0x1f1   :  { %v578_v13 = vperm.slane %v507_v2, %v577_v1 }
 0x1f3   :  { %v580_v21 = vsel %vm579_vm15, %v578_v13, %v576_v20 }
 0x1f6   :  { %v489_v59 = vpop.xlane.xlu2 %488 }
 0x1f7   :  { %v508_v7 = vadd.f32 %v951_v5, %v489_v59 }
 0x1f9   :  { %v582_v16 = vperm.slane %v508_v7, %v581_v6 }
 0x1fb   :  { %v584_v23 = vsel %vm583_vm0, %v582_v16, %v580_v21 }
 0x1fe   :  { %v491_v17 = vpop.xlane.xlu0 %490 }
 0x1ff   :  { %v509_v19 = vadd.f32 %v951_v5, %v491_v17 }
 0x201   :  { %v586_v22 = vperm.slane %v509_v19, %v585_v14 }
 0x203   :  { %v588_v24 = vsel %vm587_vm1, %v586_v22, %v584_v23 }
 0x204   :  { %590 = vst [vmem:[%s1004_s9] sm:$0x1] %v588_v24 }

</bundles_post_ra>
